<compile_context>
chip_gen: v7x
topology: tpu7x:2x2x1
jax: 0.10.0
libtpu: 0.0.40
codegen_flags: <defaults>
</compile_context>

<pallas_src>
import functools

import jax
import jax.numpy as jnp
from jax.experimental import pallas as pl
from jax.experimental.pallas import tpu as pltpu

MiB = 1024 * 1024


def _round_up(v, m):
    return ((v + m - 1) // m) * m


def _cdiv(a, b):
    return (a + b - 1) // b


def _sublane_multiple(dtype):
    # Minimum second-to-last tile dim: 8 for 32-bit, 16 for bf16, 32 for int8.
    return max(8, 32 // jnp.dtype(dtype).itemsize)


def _tpu_vmem_capacity():
    try:
        return int(pltpu.get_tpu_info().vmem_capacity_bytes)
    except Exception:
        return 64 * MiB  # conservative fallback; safe on every generation


def _ff_kernel(x_ref, w1_ref, b1_ref, w2_ref, b2_ref, gamma_ref, beta_ref,
               o_ref, acc_ref, *, eps):
    j = pl.program_id(1)

    @pl.when(j == 0)
    def _init():
        acc_ref[...] = jnp.zeros_like(acc_ref)

    # linear1 + bias + relu (dropout1 == identity in eval mode).
    # bf16 operands into the MXU, f32 accumulation; bias math stays f32.
    x = x_ref[...].astype(jnp.bfloat16)
    h = jnp.dot(x, w1_ref[...], preferred_element_type=jnp.float32)
    h = jnp.maximum(h + b1_ref[...], 0.0)

    # linear2 partial sum over this hidden slice (dropout2 == identity).
    acc_ref[...] += jnp.dot(h.astype(jnp.bfloat16), w2_ref[...],
                            preferred_element_type=jnp.float32)

    @pl.when(j == pl.num_programs(1) - 1)
    def _finalize():
        y = acc_ref[...] + b2_ref[...]
        # One-pass moments: the two lane reductions are independent so they
        # pipeline in the XLU slot (var = E[y^2] - mean^2), f32 math.
        inv_n = 1.0 / y.shape[-1]
        mean = jnp.sum(y, axis=-1, keepdims=True) * inv_n
        ex2 = jnp.sum(y * y, axis=-1, keepdims=True) * inv_n
        var = ex2 - mean * mean
        y_norm = (y - mean) * jax.lax.rsqrt(var + eps)
        o_ref[...] = (y_norm * gamma_ref[...] + beta_ref[...]).astype(o_ref.dtype)


def _vmem_estimate(tm, th, n_feature, n_hidden, io_itemsize, out_itemsize,
                   grid_h):
    wbuf = 1 if grid_h == 1 else 2               # Buffered(1) when grid-invariant
    io_tiles = 2 * tm * n_feature * (io_itemsize + out_itemsize)  # x / out, 2-buf
    weights = wbuf * 2 * (n_feature * th + th * n_feature)        # bf16 W slices
    params = wbuf * 4 * th + 3 * 4 * n_feature                    # b1 + b2/g/b
    acc = 4 * tm * n_feature                                      # f32 accumulator
    interm = 4 * tm * th + 3 * 4 * tm * n_feature                 # h + LN temps
    return io_tiles + weights + params + acc + interm


def _select_tiles(rows, n_feature, n_hidden, io_itemsize, out_itemsize,
                  vmem_budget, sub, tm_max, hidden_tile, split_for_two_cores):
    tm0 = max(sub, min(_round_up(tm_max, sub), _round_up(rows, sub)))
    if split_for_two_cores and rows > sub:
        # v7x: 2 TensorCores / chip -> make sure the parallel axis has >= 2 steps.
        tm0 = min(tm0, _round_up(_cdiv(rows, 2), sub))

    tm_cands = []
    t = tm0
    while True:
        tm_cands.append(t)
        if t <= sub:
            break
        t = max(sub, _round_up(t // 2, sub))

    if hidden_tile is not None:
        assert n_hidden % hidden_tile == 0 and (
            hidden_tile == n_hidden or hidden_tile % 128 == 0), \
            "hidden_tile must divide n_hidden and be a multiple of 128"
        th_cands = [hidden_tile]
    else:
        th_cands = [n_hidden]                    # weights fully resident (preferred)
        d = n_hidden // 2
        while d >= 128:
            if n_hidden % d == 0 and d % 128 == 0:
                th_cands.append(d)
            d //= 2

    for th in th_cands:
        grid_h = n_hidden // th
        for tm in tm_cands:
            if _vmem_estimate(tm, th, n_feature, n_hidden, io_itemsize,
                              out_itemsize, grid_h) <= vmem_budget:
                return tm, th
    return tm_cands[-1], th_cands[-1]


def feed_forward(x, w1, b1, w2, b2, gamma, beta, *, eps=1e-5, tm_max=512,
                 hidden_tile=None):
    """Eval-mode FeedForward: layernorm(relu(x @ w1 + b1) @ w2 + b2).

    x: [..., n_feature]; w1: (n_feature, n_hidden); w2: (n_hidden, n_feature).
    Pass weights pre-cast to bf16 (cast once at parameter setup); the wrapper
    only casts if they are not, avoiding a per-call f32->bf16 HBM round trip.
    """
    orig_shape = x.shape
    n_feature = orig_shape[-1]
    n_hidden = w1.shape[1]
    rows = 1
    for d in orig_shape[:-1]:
        rows *= d
    x2d = x.reshape(rows, n_feature)

    out_dtype = x.dtype
    io_itemsize = jnp.dtype(x.dtype).itemsize
    out_itemsize = jnp.dtype(out_dtype).itemsize
    sub = _sublane_multiple(x.dtype)

    vmem_cap = _tpu_vmem_capacity()
    vmem_budget = int(vmem_cap * 0.78)           # leave Mosaic internal-scratch headroom
    two_cores = vmem_cap <= 64 * MiB             # v7x heuristic (64 MiB VMEM, 2 TCs)

    tm, th = _select_tiles(rows, n_feature, n_hidden, io_itemsize, out_itemsize,
                           vmem_budget, sub, tm_max, hidden_tile, two_cores)
    grid_m = _cdiv(rows, tm)
    grid_h = n_hidden // th
    weights_resident = grid_h == 1

    # MXU-native bf16 weights; cast only if caller didn't pre-cast.
    w1_b = w1 if w1.dtype == jnp.bfloat16 else w1.astype(jnp.bfloat16)
    w2_b = w2 if w2.dtype == jnp.bfloat16 else w2.astype(jnp.bfloat16)

    # Bias / LayerNorm params stay f32 (elementwise math is f32 in-kernel).
    b1_2d = b1.reshape(1, n_hidden).astype(jnp.float32)
    b2_2d = b2.reshape(1, n_feature).astype(jnp.float32)
    gamma_2d = gamma.reshape(1, n_feature).astype(jnp.float32)
    beta_2d = beta.reshape(1, n_feature).astype(jnp.float32)

    est = _vmem_estimate(tm, th, n_feature, n_hidden, io_itemsize, out_itemsize,
                         grid_h)
    vmem_limit = int(min(vmem_budget, max(2 * est, 32 * MiB)))

    # Advisory cost estimate for XLA scheduling.
    flops = 4 * rows * n_feature * n_hidden + 8 * rows * n_feature
    weight_bytes = 2 * (n_feature * n_hidden + n_hidden * n_feature)
    weight_passes = 1 if weights_resident else grid_m
    bytes_accessed = (rows * n_feature * (io_itemsize + out_itemsize)
                      + weight_passes * weight_bytes
                      + 4 * (n_hidden + 3 * n_feature))
    cost = pl.CostEstimate(flops=flops, transcendentals=rows,
                           bytes_accessed=bytes_accessed)

    def spec(shape, index_map, resident):
        # Single-buffer grid-invariant operands (no wasted second VMEM buffer).
        if resident:
            return pl.BlockSpec(shape, index_map, pipeline_mode=pl.Buffered(1))
        return pl.BlockSpec(shape, index_map)

    in_specs = [
        pl.BlockSpec((tm, n_feature), lambda i, j: (i, 0)),             # x row tile
        spec((n_feature, th), lambda i, j: (0, j), weights_resident),   # W1 slice (bf16)
        spec((1, th), lambda i, j: (0, j), weights_resident),           # b1 slice
        spec((th, n_feature), lambda i, j: (j, 0), weights_resident),   # W2 slice (bf16)
        spec((1, n_feature), lambda i, j: (0, 0), True),                # b2
        spec((1, n_feature), lambda i, j: (0, 0), True),                # gamma
        spec((1, n_feature), lambda i, j: (0, 0), True),                # beta
    ]

    out = pl.pallas_call(
        functools.partial(_ff_kernel, eps=eps),
        out_shape=jax.ShapeDtypeStruct((rows, n_feature), out_dtype),
        grid_spec=pltpu.PrefetchScalarGridSpec(
            num_scalar_prefetch=0,
            grid=(grid_m, grid_h),
            in_specs=in_specs,
            out_specs=pl.BlockSpec((tm, n_feature), lambda i, j: (i, 0)),
            scratch_shapes=[pltpu.VMEM((tm, n_feature), jnp.float32)],
        ),
        compiler_params=pltpu.CompilerParams(
            dimension_semantics=("parallel", "arbitrary"),
            vmem_limit_bytes=vmem_limit,
        ),
        cost_estimate=cost,
    )(x2d, w1_b, b1_2d, w2_b, b2_2d, gamma_2d, beta_2d)

    return out.reshape(orig_shape)


if __name__ == "__main__":
    # Small shapes consistent with the module (FeedForward(n_feature, n_hidden)).
    n_feature, n_hidden = 256, 256
    batch, seq = 2, 8

    key = jax.random.PRNGKey(0)
    kx, k1, k2, kb1, kb2 = jax.random.split(key, 5)

    x = jax.random.normal(kx, (batch, seq, n_feature), dtype=jnp.float32)

    # Parameters stored (in, out) so the kernel does x @ W + b.
    w1 = jax.random.normal(k1, (n_feature, n_hidden), dtype=jnp.float32) * 0.02
    b1 = jax.random.normal(kb1, (n_hidden,), dtype=jnp.float32) * 0.02
    w2 = jax.random.normal(k2, (n_hidden, n_feature), dtype=jnp.float32) * 0.02
    b2 = jax.random.normal(kb2, (n_feature,), dtype=jnp.float32) * 0.02
    gamma = jnp.ones((n_feature,), dtype=jnp.float32)
    beta = jnp.zeros((n_feature,), dtype=jnp.float32)

    # Pre-cast weights to bf16 ONCE (parameter setup time), not per call.
    w1_b = jax.block_until_ready(w1.astype(jnp.bfloat16))
    w2_b = jax.block_until_ready(w2.astype(jnp.bfloat16))

    # Pure-JAX f32 reference (eval-mode dropout == identity). Kernel uses bf16
    # MXU operands with f32 accumulation -> relaxed tolerance.
    h_ref = jnp.maximum(x @ w1 + b1, 0.0)
    y_ref = h_ref @ w2 + b2
    mean = y_ref.mean(-1, keepdims=True)
    var = ((y_ref - mean) ** 2).mean(-1, keepdims=True)
    ref = (y_ref - mean) * jax.lax.rsqrt(var + 1e-5) * gamma + beta

    # 1) Default path: weights fully VMEM-resident (grid_h == 1), Buffered(1).
    out1 = jax.block_until_ready(feed_forward(x, w1_b, b1, w2_b, b2, gamma, beta))
    assert out1.shape == x.shape
    assert jnp.allclose(out1, ref, atol=3e-2, rtol=3e-2)

    # 2) Forced hidden-axis split + multi-step row grid: exercises the
    #    "arbitrary" reduction axis + f32 accumulator path used when weights
    #    exceed the VMEM budget (e.g. transformer scale on v7x's 64 MiB).
    out2 = jax.block_until_ready(
        feed_forward(x, w1_b, b1, w2_b, b2, gamma, beta, tm_max=8, hidden_tile=128))
    assert jnp.allclose(out2, ref, atol=3e-2, rtol=3e-2)

    # 3) bf16 activation path (halves streamed HBM bytes when mem-bound, v5e).
    out3 = jax.block_until_ready(
        feed_forward(x.astype(jnp.bfloat16), w1_b, b1, w2_b, b2, gamma, beta))
    assert out3.dtype == jnp.bfloat16
    assert jnp.allclose(out3.astype(jnp.float32), ref, atol=1e-1, rtol=1e-1)

    print("KERNEL_OK")
</pallas_src>

<mosaic_0001>
module attributes {stable_mosaic.version = 11 : i64} {
  func.func @_ff_kernel(%arg0: i32, %arg1: i32, %arg2: memref<8x256xf32, #tpu.memory_space<vmem>>, %arg3: memref<256x256xbf16, #tpu.memory_space<vmem>>, %arg4: memref<1x256xf32, #tpu.memory_space<vmem>>, %arg5: memref<256x256xbf16, #tpu.memory_space<vmem>>, %arg6: memref<1x256xf32, #tpu.memory_space<vmem>>, %arg7: memref<1x256xf32, #tpu.memory_space<vmem>>, %arg8: memref<1x256xf32, #tpu.memory_space<vmem>>, %arg9: memref<8x256xf32, #tpu.memory_space<vmem>>, %arg10: memref<8x256xf32, #tpu.memory_space<vmem>>) attributes {dimension_semantics = [#tpu.dimension_semantics<parallel>, #tpu.dimension_semantics<arbitrary>], iteration_bounds = array<i64: 2, 1>, scalar_prefetch = 0 : i64, scratch_operands = 1 : i64, tpu.core_type = #tpu.core_type<tc>, window_params = [{transform_indices = @transform_0, window_bounds = array<i64: 8, 256>}, {pipeline_mode = #tpu.pipeline_mode<synchronous>, transform_indices = @transform_1, window_bounds = array<i64: 256, 256>}, {pipeline_mode = #tpu.pipeline_mode<synchronous>, transform_indices = @transform_2, window_bounds = array<i64: 1, 256>}, {pipeline_mode = #tpu.pipeline_mode<synchronous>, transform_indices = @transform_3, window_bounds = array<i64: 256, 256>}, {pipeline_mode = #tpu.pipeline_mode<synchronous>, transform_indices = @transform_4, window_bounds = array<i64: 1, 256>}, {pipeline_mode = #tpu.pipeline_mode<synchronous>, transform_indices = @transform_5, window_bounds = array<i64: 1, 256>}, {pipeline_mode = #tpu.pipeline_mode<synchronous>, transform_indices = @transform_6, window_bounds = array<i64: 1, 256>}, {transform_indices = @transform_7, window_bounds = array<i64: 8, 256>}]} {
    %c0_i32 = arith.constant 0 : i32
    %0 = arith.cmpi eq, %arg1, %c0_i32 : i32
    %1 = arith.extui %0 : i1 to i32
    %c0_i32_0 = arith.constant 0 : i32
    %2 = arith.cmpi ne, %1, %c0_i32_0 : i32
    scf.if %2 {
      %cst_16 = arith.constant 0.000000e+00 : f32
      %21 = vector.broadcast %cst_16 : f32 to vector<8x256xf32>
      %c0_17 = arith.constant 0 : index
      %c0_18 = arith.constant 0 : index
      %22 = vector.load %arg10[%c0_17, %c0_18] : memref<8x256xf32, #tpu.memory_space<vmem>>, vector<8x256xf32>
      tpu.vector_store %arg10[%c0_17, %c0_18], %21 {strides = array<i32>} : memref<8x256xf32, #tpu.memory_space<vmem>>, vector<8x256xf32>,
    } else {
    }
    %c0 = arith.constant 0 : index
    %c0_1 = arith.constant 0 : index
    %3 = vector.load %arg2[%c0, %c0_1] : memref<8x256xf32, #tpu.memory_space<vmem>>, vector<8x256xf32>
    %4 = arith.truncf %3 : vector<8x256xf32> to vector<8x256xbf16>
    %c0_2 = arith.constant 0 : index
    %c0_3 = arith.constant 0 : index
    %5 = vector.load %arg3[%c0_2, %c0_3] : memref<256x256xbf16, #tpu.memory_space<vmem>>, vector<256x256xbf16>
    %cst = arith.constant dense<0.000000e+00> : vector<8x256xf32>
    %6 = tpu.matmul %4, %5, %cst {dimension_numbers = #tpu.dot_dimension_numbers<[1], [0], [0], [1], [0, 0, 1, 1], [], []>} : vector<8x256xbf16>, vector<256x256xbf16>, vector<8x256xf32> -> vector<8x256xf32>
    %c0_4 = arith.constant 0 : index
    %c0_5 = arith.constant 0 : index
    %7 = vector.load %arg4[%c0_4, %c0_5] : memref<1x256xf32, #tpu.memory_space<vmem>>, vector<1x256xf32>
    %8 = vector.broadcast %7 : vector<1x256xf32> to vector<8x256xf32>
    %9 = arith.addf %6, %8 : vector<8x256xf32>
    %cst_6 = arith.constant 0.000000e+00 : f32
    %10 = vector.broadcast %cst_6 : f32 to vector<8x256xf32>
    %11 = arith.maximumf %9, %10 : vector<8x256xf32>
    %c0_7 = arith.constant 0 : index
    %c0_8 = arith.constant 0 : index
    %12 = vector.load %arg10[%c0_7, %c0_8] : memref<8x256xf32, #tpu.memory_space<vmem>>, vector<8x256xf32>
    %13 = arith.truncf %11 : vector<8x256xf32> to vector<8x256xbf16>
    %c0_9 = arith.constant 0 : index
    %c0_10 = arith.constant 0 : index
    %14 = vector.load %arg5[%c0_9, %c0_10] : memref<256x256xbf16, #tpu.memory_space<vmem>>, vector<256x256xbf16>
    %cst_11 = arith.constant dense<0.000000e+00> : vector<8x256xf32>
    %15 = tpu.matmul %13, %14, %cst_11 {dimension_numbers = #tpu.dot_dimension_numbers<[1], [0], [0], [1], [0, 0, 1, 1], [], []>} : vector<8x256xbf16>, vector<256x256xbf16>, vector<8x256xf32> -> vector<8x256xf32>
    %16 = arith.addf %12, %15 : vector<8x256xf32>
    %c0_12 = arith.constant 0 : index
    %c0_13 = arith.constant 0 : index
    %17 = vector.load %arg10[%c0_12, %c0_13] : memref<8x256xf32, #tpu.memory_space<vmem>>, vector<8x256xf32>
    tpu.vector_store %arg10[%c0_12, %c0_13], %16 {strides = array<i32>} : memref<8x256xf32, #tpu.memory_space<vmem>>, vector<8x256xf32>,
    %c0_i32_14 = arith.constant 0 : i32
    %18 = arith.cmpi eq, %arg1, %c0_i32_14 : i32
    %19 = arith.extui %18 : i1 to i32
    %c0_i32_15 = arith.constant 0 : i32
    %20 = arith.cmpi ne, %19, %c0_i32_15 : i32
    scf.if %20 {
      %c0_16 = arith.constant 0 : index
      %c0_17 = arith.constant 0 : index
      %21 = vector.load %arg10[%c0_16, %c0_17] : memref<8x256xf32, #tpu.memory_space<vmem>>, vector<8x256xf32>
      %c0_18 = arith.constant 0 : index
      %c0_19 = arith.constant 0 : index
      %22 = vector.load %arg6[%c0_18, %c0_19] : memref<1x256xf32, #tpu.memory_space<vmem>>, vector<1x256xf32>
      %23 = vector.broadcast %22 : vector<1x256xf32> to vector<8x256xf32>
      %24 = arith.addf %21, %23 : vector<8x256xf32>
      %cst_20 = arith.constant dense<0.000000e+00> : vector<8xf32>
      %25 = vector.multi_reduction <add>, %24, %cst_20 [1] : vector<8x256xf32> to vector<8xf32>
      %26 = vector.shape_cast %25 : vector<8xf32> to vector<8x1xf32>
      %cst_21 = arith.constant 3.906250e-03 : f32
      %27 = vector.broadcast %cst_21 : f32 to vector<8x1xf32>
      %28 = arith.mulf %26, %27 : vector<8x1xf32>
      %29 = arith.mulf %24, %24 : vector<8x256xf32>
      %cst_22 = arith.constant dense<0.000000e+00> : vector<8xf32>
      %30 = vector.multi_reduction <add>, %29, %cst_22 [1] : vector<8x256xf32> to vector<8xf32>
      %31 = vector.shape_cast %30 : vector<8xf32> to vector<8x1xf32>
      %cst_23 = arith.constant 3.906250e-03 : f32
      %32 = vector.broadcast %cst_23 : f32 to vector<8x1xf32>
      %33 = arith.mulf %31, %32 : vector<8x1xf32>
      %34 = arith.mulf %28, %28 : vector<8x1xf32>
      %35 = arith.subf %33, %34 : vector<8x1xf32>
      %36 = vector.broadcast %28 : vector<8x1xf32> to vector<8x256xf32>
      %37 = arith.subf %24, %36 : vector<8x256xf32>
      %cst_24 = arith.constant 9.99999974E-6 : f32
      %38 = vector.broadcast %cst_24 : f32 to vector<8x1xf32>
      %39 = arith.addf %35, %38 : vector<8x1xf32>
      %40 = math.rsqrt %39 : vector<8x1xf32>
      %41 = vector.broadcast %40 : vector<8x1xf32> to vector<8x256xf32>
      %42 = arith.mulf %37, %41 : vector<8x256xf32>
      %c0_25 = arith.constant 0 : index
      %c0_26 = arith.constant 0 : index
      %43 = vector.load %arg7[%c0_25, %c0_26] : memref<1x256xf32, #tpu.memory_space<vmem>>, vector<1x256xf32>
      %44 = vector.broadcast %43 : vector<1x256xf32> to vector<8x256xf32>
      %45 = arith.mulf %42, %44 : vector<8x256xf32>
      %c0_27 = arith.constant 0 : index
      %c0_28 = arith.constant 0 : index
      %46 = vector.load %arg8[%c0_27, %c0_28] : memref<1x256xf32, #tpu.memory_space<vmem>>, vector<1x256xf32>
      %47 = vector.broadcast %46 : vector<1x256xf32> to vector<8x256xf32>
      %48 = arith.addf %45, %47 : vector<8x256xf32>
      %c0_29 = arith.constant 0 : index
      %c0_30 = arith.constant 0 : index
      %49 = vector.load %arg9[%c0_29, %c0_30] : memref<8x256xf32, #tpu.memory_space<vmem>>, vector<8x256xf32>
      tpu.vector_store %arg9[%c0_29, %c0_30], %48 {strides = array<i32>} : memref<8x256xf32, #tpu.memory_space<vmem>>, vector<8x256xf32>,
    } else {
    }
    return
  }
  func.func @transform_0(%arg0: i32, %arg1: i32) -> (i32, i32) {
    %c0_i32 = arith.constant 0 : i32
    %c0_i32_0 = arith.constant 0 : i32
    return %arg0, %c0_i32 : i32, i32
  }
  func.func @transform_1(%arg0: i32, %arg1: i32) -> (i32, i32) {
    %c0_i32 = arith.constant 0 : i32
    %c0_i32_0 = arith.constant 0 : i32
    return %c0_i32, %arg1 : i32, i32
  }
  func.func @transform_2(%arg0: i32, %arg1: i32) -> (i32, i32) {
    %c0_i32 = arith.constant 0 : i32
    %c0_i32_0 = arith.constant 0 : i32
    return %c0_i32, %arg1 : i32, i32
  }
  func.func @transform_3(%arg0: i32, %arg1: i32) -> (i32, i32) {
    %c0_i32 = arith.constant 0 : i32
    %c0_i32_0 = arith.constant 0 : i32
    return %arg1, %c0_i32 : i32, i32
  }
  func.func @transform_4(%arg0: i32, %arg1: i32) -> (i32, i32) {
    %c0_i32 = arith.constant 0 : i32
    %c0_i32_0 = arith.constant 0 : i32
    %c0_i32_1 = arith.constant 0 : i32
    return %c0_i32, %c0_i32_0 : i32, i32
  }
  func.func @transform_5(%arg0: i32, %arg1: i32) -> (i32, i32) {
    %c0_i32 = arith.constant 0 : i32
    %c0_i32_0 = arith.constant 0 : i32
    %c0_i32_1 = arith.constant 0 : i32
    return %c0_i32, %c0_i32_0 : i32, i32
  }
  func.func @transform_6(%arg0: i32, %arg1: i32) -> (i32, i32) {
    %c0_i32 = arith.constant 0 : i32
    %c0_i32_0 = arith.constant 0 : i32
    %c0_i32_1 = arith.constant 0 : i32
    return %c0_i32, %c0_i32_0 : i32, i32
  }
  func.func @transform_7(%arg0: i32, %arg1: i32) -> (i32, i32) {
    %c0_i32 = arith.constant 0 : i32
    %c0_i32_0 = arith.constant 0 : i32
    return %arg0, %c0_i32 : i32, i32
  }
}

</mosaic_0001>

<bundles_post_ra>
// kernel: tpu_custom_call.1
= control target key start
LH: loop header
LB: loop body
LE: loop exit
PB: predicated region body
PF: predicated region fallthrough
CT: control target
= control target key end

     0   :  { %12 = vsyncpa [#allocation4], 0  ;;  %s1826_s0 = inlined_call_operand.hbm [shape: f32[16,256], index: 0, kind: input, shape index: {}]   ;;  %s1827_s1 = inlined_call_operand.hbm [shape: bf16[256,256], index: 1, kind: input, shape index: {}]   ;;  %s1828_s2 = inlined_call_operand.vmem [shape: f32[1,256], index: 2, kind: input, shape index: {}]   ;;  %s1829_s3 = inlined_call_operand.hbm [shape: bf16[256,256], index: 3, kind: input, shape index: {}]   ;;  %s1830_s4 = inlined_call_operand.vmem [shape: f32[1,256], index: 4, kind: input, shape index: {}]   ;;  %s1831_s5 = inlined_call_operand.vmem [shape: f32[1,256], index: 5, kind: input, shape index: {}]   ;;  %s1832_s6 = inlined_call_operand.vmem [shape: f32[1,256], index: 6, kind: input, shape index: {}]   ;;  %s1833_s7 = inlined_call_operand.hbm [shape: f32[16,256], index: 7, kind: output, shape index: {}]  }
   0x1   :  { %14 = vsyncpa [#allocation4 + $0x1], 0 }
   0x2   :  { %15 = vsyncpa [#allocation7], 0 }
   0x3   :  { %16 = vsyncpa [#allocation5], 0 }
   0x4   :  { %18 = vsyncpa [#allocation5 + $0x1], 0  ;;  %s1556_s24 = smov 0   ;;  %s1558_s25 = smov 0  }
   0x5   :  { %s1560_s26 = smov 0   ;;  %s1562_s27 = smov 0  }
   0x6   :  { %s1564_s28 = smov 0   ;;  %s1566_s29 = smov 0  }
   0x7 LB: > { %1840 = sst [smem:[#allocation13_spill]] %s1488_s24  ;;  %s1067_s30 = sadd.s32 4294967295, %s1508_s29   ;;  %s1508_s29 = sphi %s1566_s29, %s24_s29   ;;  %s1504_s28 = sphi %s1564_s28, %s1861_s28   ;;  %s1500_s27 = sphi %s1562_s27, %s1860_s27   ;;  %s1496_s26 = sphi %s1560_s26, %s1859_s26   ;;  %s1492_s25 = sphi %s1558_s25, %s1858_s25   ;;  %s1488_s24 = sphi %s1556_s24, %s1857_s24  }
   0x8   : > { %s1068_s8 = sadd.s32 4294967294, %s1508_s29   ;;  %p56_p0 = scmp.ne.s32.totalorder %s1492_s25, %s1488_s24 }
   0x9   : > { %p1590_p1 = scmp.eq.s32.totalorder %s1067_s30, 0  ;;  %p1594_p2 = scmp.eq.s32.totalorder %s1067_s30, 1 }
   0xa   : > { %p227_p3 = scmp.eq.s32.totalorder %s1068_s8, 1  ;;  %p1069_p5 = scmp.ge.s32.totalorder %s1508_s29, 1 }
   0xb   : > { %s1841_s9 = scalar_select %p1590_p1, 1, 0 }
   0xc   : > { %p1600_p4 = por %p1590_p1, %p56_p0  ;;  %p1605_p6 = por %p227_p3, %p56_p0 }
   0xd   : > { %p234_p7 = scmp.lt.s32.totalorder %s1508_s29, 3  ;;  %s1510_s14 = smov [#allocation6]  }
   0xe   : > { %s1843_s11 = scalar_select %p1600_p4, 1, 0 }
   0xf   : > { %s1844_s12 = scalar_select %p1605_p6, 1, 0 }
  0x10   : > { %p1610_p8 = pnand %p1069_p5, %p234_p7  ;;  %s249_s15 = sshll.u32 %s1510_s14, 4  ;;  %s1614_s15 = int_to_ptr.vmem [resolvable:$true] %s249_s15 }
  0x11   : > { %1845 = sst [smem:[#allocation14_spill]] %s1844_s12  ;;  %s1511_s17 = smov [#allocation8]  }
  0x12   : > { %p1165_p9 = pneg %p1610_p8  ;;  %s274_s18 = sshll.u32 %s1511_s17, 4  ;;  %s1625_s18 = int_to_ptr.vmem [resolvable:$true] %s274_s18 }
  0x13   : > { %s1336_s21 = scalar_lea.hbm %s1827_s1, 4096 }
  0x14   : > { %p1621_p11 = pnand %p1165_p9, %p1590_p1  ;;  %p1337_p12 = scmp.ne.s32.totalorder %s1827_s1, %s1336_s21 }
  0x15   : > { %p1343_p5 = scmp.lt.u32.totalorder %s1336_s21, %s1827_s1 }
  0x16   : > { %p1338_p13 = pneg %p1621_p11 }
  0x18   : > { %p1339_p0 = pnand %p1338_p13, %p1337_p12 }
  0x1a   : > { %p1340_p3 = pneg %p1339_p0 }
  0x1c   : > { %p1345_p7 = pnand %p1343_p5, %p1340_p3 }
  0x1e   : > { %1348 = shalt.err (!%p1345_p7)
}
  0x1f   : > { %s1349_s14 = scalar_lea.vmem %s1614_s15, 4096  ;;  %p1357_p1 = scmp.lt.s32.totalorder %s1614_s15, %s1614_s15 }
  0x20   : > { %p1350_p9 = scmp.ne.s32.totalorder %s1614_s15, %s1349_s14  ;;  %p1358_p12 = scmp.lt.s32.totalorder %s1349_s14, %s1349_s14 }
  0x22   : > { %p1352_p10 = pnand %p1350_p9, %p1338_p13  ;;  %p1359_p0 = por %p1358_p12, %p1357_p1 }
  0x24   : > { %p1353_p6 = pneg %p1352_p10 }
  0x26   : > { %p1360_p4 = pnand %p1359_p0, %p1353_p6 }
  0x28   : > { %1363 = shalt.err (!%p1360_p4)
}
  0x29   : > { %s1512_s17 = smov 128   ;;  %s1513_s19 = smov 8  }
  0x2a   : > { %1168 = dma.hbm_to_vmem [thread:$0]  (!%p1621_p11), %s1827_s1, 4096, %s1614_s15, [#allocation7], %s1512_s17, %s1512_s17, %s1513_s19  }
  0x2b   : > { %s1364_s30 = scalar_lea.hbm %s1829_s3, 4096 }
  0x2c   : > { %p1365_p1 = scmp.ne.s32.totalorder %s1829_s3, %s1364_s30  ;;  %p1371_p10 = scmp.lt.u32.totalorder %s1364_s30, %s1829_s3 }
  0x2e   : > { %p1367_p4 = pnand %p1365_p1, %p1338_p13 }
  0x30   : > { %p1368_p6 = pneg %p1367_p4 }
  0x32   : > { %p1373_p3 = pnand %p1371_p10, %p1368_p6 }
  0x34   : > { %1376 = shalt.err (!%p1373_p3)
}
  0x35   : > { %s1377_s15 = scalar_lea.vmem %s1625_s18, 4096  ;;  %p1385_p12 = scmp.lt.s32.totalorder %s1625_s18, %s1625_s18 }
  0x36   : > { %p1378_p5 = scmp.ne.s32.totalorder %s1625_s18, %s1377_s15  ;;  %p1386_p0 = scmp.lt.s32.totalorder %s1377_s15, %s1377_s15 }
  0x38   : > { %p1380_p7 = pnand %p1378_p5, %p1338_p13  ;;  %p1387_p1 = por %p1386_p0, %p1385_p12 }
  0x3a   : > { %p1381_p9 = pneg %p1380_p7 }
  0x3c   : > { %p1388_p4 = pnand %p1387_p1, %p1381_p9 }
  0x3e   : > { %1391 = shalt.err (!%p1388_p4)
}
  0x3f   : > { %1171 = dma.hbm_to_vmem [thread:$0]  (!%p1621_p11), %s1829_s3, 4096, %s1625_s18, [#allocation7], %s1512_s17, %s1512_s17, %s1513_s19  }
  0x40   : > { %s36_s20 = sadd.s32 1, %s1504_s28  ;;  %s43_s21 = sadd.s32 1, %s1496_s26 }
  0x41   : > { %p38_p13 = scmp.ge.s32.totalorder %s36_s20, 2  ;;  %p50_p6 = scmp.ne.s32.totalorder %s1496_s26, %s1492_s25 }
  0x42   : > { %p51_p10 = scmp.eq.s32.totalorder %s1508_s29, 0  ;;  %p1182_p3 = scmp.lt.s32.totalorder %s1508_s29, 2 }
  0x43   : > { %s1863_s20 = smov (%p38_p13, %s36_s20), 0  ;;  %p1689_p7 = por %p1594_p2, %p50_p6 }
  0x44   : > { %p52_p5 = por %p51_p10, %p50_p6  ;;  %s40_s22 = ssub.s32 %s1504_s28, %s1863_s20 }
  0x45   : > { %s1848_s16 = scalar_select %p1689_p7, 1, 0 }
  0x46   : > { %s297_s23 = sand.u32 1, %s1496_s26   ;;  %p41_p9 = scmp.eq.s32.totalorder %s40_s22, 0 }
  0x47   : > { %s1074_s18 = sshll.u32 %s297_s23, 4  ;;  %s1151_s17 = sshll.u32 %s1504_s28, 8 }
  0x48   : > { %s1698_s19 = scalar_select %p41_p9, %s1496_s26, %s43_s21  }
  0x49   : > { %s1703_s14 = scalar_lea.hbm %s1826_s0, %s1151_s17  ;;  %s301_s10 = scalar_lea.vmem [#allocation3], %s1074_s18 }
  0x4a   : > { %s309_s15 = sshll.u32 %s301_s10, 4  ;;  %p1707_p2 = pnand %p1182_p3, %p52_p5  ;;  %s1711_s15 = int_to_ptr.vmem [resolvable:$true] %s309_s15 }
  0x4b   : > { %s298_s12 = scalar_lea.sflag [#allocation4], %s297_s23  ;;  %s1392_s21 = scalar_lea.hbm %s1703_s14, 256 }
  0x4c   : > { %p1393_p11 = scmp.ne.s32.totalorder %s1703_s14, %s1392_s21  ;;  %p1394_p12 = pneg %p1707_p2 }
  0x4d   : > { %s1397_s17 = scalar_lea.hbm %s1826_s0, 512  ;;  %p1398_p4 = scmp.lt.u32.totalorder %s1703_s14, %s1826_s0 }
  0x4e   : > { %p1395_p0 = pnand %p1394_p12, %p1393_p11  ;;  %p1399_p13 = scmp.lt.u32.totalorder %s1397_s17, %s1392_s21 }
  0x4f   : > { %p1401_p10 = scmp.lt.u32.totalorder %s1392_s21, %s1703_s14 }
  0x50   : > { %p1396_p1 = pneg %p1395_p0  ;;  %p1400_p6 = por %p1399_p13, %p1398_p4 }
  0x52   : > { %p1402_p3 = por %p1401_p10, %p1400_p6 }
  0x54   : > { %p1403_p5 = pnand %p1402_p3, %p1396_p1 }
  0x56   : > { %1406 = shalt.err (!%p1403_p5)
}
  0x57   : > { %s1407_s23 = scalar_lea.vmem %s1711_s15, 256  ;;  %s1514_s10 = smov [#allocation3]  }
  0x58   : > { %p1408_p9 = scmp.ne.s32.totalorder %s1711_s15, %s1407_s23  ;;  %s1412_s22 = sshll.u32 %s1514_s10, 4  ;;  %s1413_s22 = int_to_ptr.vmem [resolvable:$false] %s1412_s22 }
  0x59   : > { %s1414_s18 = scalar_lea.vmem %s1413_s22, 512  ;;  %p1415_p7 = scmp.lt.s32.totalorder %s1711_s15, %s1413_s22 }
  0x5a   : > { %p1410_p11 = pnand %p1408_p9, %p1394_p12  ;;  %p1416_p4 = scmp.lt.s32.totalorder %s1414_s18, %s1407_s23 }
  0x5c   : > { %p1411_p0 = pneg %p1410_p11  ;;  %p1417_p13 = por %p1416_p4, %p1415_p7 }
  0x5e   : > { %p1418_p6 = pnand %p1417_p13, %p1411_p0 }
  0x60   : > { %1421 = shalt.err (!%p1418_p6)
}
  0x61   : > { %1175 = dma.hbm_to_vmem [thread:$0]  (!%p1707_p2), %s1703_s14, 256, %s1711_s15, %s298_s12  }
  0x62   : > { %318 = sbr.rel (%p1610_p8) target bundleno = 794 (0x31a), region = 48  ;;  %s1741_s21 = sand.u32 (!%p1610_p8), 1, %s1492_s25  }
  0x63   : > { %s1078_s17 = sshll.u32 (!%p1610_p8), %s1741_s21, 4  ;;  %s321_s30 = scalar_lea.sflag (!%p1610_p8), [#allocation4], %s1741_s21 }
  0x64   : > { %s1747_s8 = scalar_lea.vmem (!%p1610_p8), [#allocation3], %s1078_s17  ;;  %p1850_p7 = scmp.ne.s32.totalorder (!%p1610_p8), %s1843_s11, 0 }
  0x69   : > { %1475 = dma.done.wait (%p1850_p7), %s321_s30, 256  }
  0x6a   : > { %1477 = vsyncadd (%p1850_p7), %s321_s30, 4294967040  ;;  %p1851_p2 = scmp.ne.s32.totalorder %s1841_s9, 0 }
  0x6c   : > { %1479 = dma.done.wait (%p1851_p2), [#allocation7], 8192  }
  0x6d   : > { %1481 = vsyncadd (%p1851_p2), [#allocation7], 4294959104  ;;  %v1238_v0 = vld [vmem:[#allocation6 + $0x4] ss:$8 sps:$4 sm:$0xff]   ;;  %v1240_v1 = vld [vmem:[#allocation6] ss:$8 sps:$4 sm:$0xff]  }
  0x6e   : > { %588 = vmatprep.subr.bf16.mxu0 %v1238_v0  ;;  %v1241_v2 = vld [vmem:[#allocation6 + $0x14] ss:$8 sps:$4 sm:$0xff]   ;;  %v1243_v3 = vld [vmem:[#allocation6 + $0x10] ss:$8 sps:$4 sm:$0xff]   ;;  %v1244_v4 = vld [vmem:[#allocation6 + $0x24] ss:$8 sps:$4 sm:$0xff]  }
  0x6f   : > { %589 = vmatpush1.bf16.msra.mxu0 %v1240_v1  ;;  %v1246_v5 = vld [vmem:[#allocation6 + $0x20] ss:$8 sps:$4 sm:$0xff]   ;;  %v1247_v6 = vld [vmem:[#allocation6 + $0x34] ss:$8 sps:$4 sm:$0xff]   ;;  %v1249_v7 = vld [vmem:[#allocation6 + $0x30] ss:$8 sps:$4 sm:$0xff]  }
  0x70   : > { %590 = vmatprep.subr.bf16.mxu0 %v1241_v2  ;;  %v1250_v8 = vld [vmem:[#allocation6 + $0x44] ss:$8 sps:$4 sm:$0xff]   ;;  %v1252_v9 = vld [vmem:[#allocation6 + $0x40] ss:$8 sps:$4 sm:$0xff]   ;;  %v1253_v10 = vld [vmem:[#allocation6 + $0x54] ss:$8 sps:$4 sm:$0xff]  }
  0x71   : > { %v1255_v11 = vld [vmem:[#allocation6 + $0x50] ss:$8 sps:$4 sm:$0xff]   ;;  %v1256_v12 = vld [vmem:[#allocation6 + $0x64] ss:$8 sps:$4 sm:$0xff]   ;;  %v1258_v13 = vld [vmem:[#allocation6 + $0x60] ss:$8 sps:$4 sm:$0xff]  }
  0x72   : > { %v381_v14 = vld [vmem:[%s1747_s8 + $0x8] sm:$0xff]  ;;  %v380_v54 = vld [vmem:[%s1747_s8] sm:$0xff]  ;;  %s1152_s10 = sshll.u32 %s1500_s27, 8  ;;  %s366_s22 = scalar_lea.vmem [#allocation9], %s1078_s17 }
  0x73   : > { %591 = vmatpush1.bf16.msra.mxu0 %v1243_v3  ;;  %v383_v15 = vpack.c.bf16 %v381_v14, %v381_v14  ;;  %v1286_v16 = vld [vmem:[#allocation8 + $0x4] ss:$8 sps:$4 sm:$0xff]   ;;  %v1288_v17 = vld [vmem:[#allocation8] ss:$8 sps:$4 sm:$0xff]   ;;  %v1259_v18 = vld [vmem:[#allocation6 + $0x74] ss:$8 sps:$4 sm:$0xff]   ;;  %v382_v56 = vpack.c.bf16 %v380_v54, %v380_v54  ;;  %s1777_s9 = scalar_lea.hbm %s1833_s7, %s1152_s10 }
  0x74   : > { %592 = vmatprep.subr.bf16.mxu0 %v1244_v4  ;;  %v1289_v19 = vld [vmem:[#allocation8 + $0x14] ss:$8 sps:$4 sm:$0xff]   ;;  %v1261_v20 = vld [vmem:[#allocation6 + $0x70] ss:$8 sps:$4 sm:$0xff]   ;;  %827 = vmatprep.subr.bf16.mxu1 %v1286_v16  ;;  %v1292_v22 = vld [vmem:[#allocation8 + $0x24] ss:$8 sps:$4 sm:$0xff]   ;;  %v418_v4 = vlaneseq }
  0x75   : > { %620 = vmatprep.mubr.bf16.mxu0 %v383_v15  ;;  %828 = vmatpush1.bf16.msra.mxu1 %v1288_v17  ;;  %v1291_v21 = vld [vmem:[#allocation8 + $0x10] ss:$8 sps:$4 sm:$0xff]   ;;  %v1262_v23 = vld [vmem:[#allocation6 + $0x84] ss:$8 sps:$4 sm:$0xff]   ;;  %v1264_v24 = vld [vmem:[#allocation6 + $0x80] ss:$8 sps:$4 sm:$0xff]  }
  0x76   : > { %829 = vmatprep.subr.bf16.mxu1 %v1289_v19  ;;  %v1294_v25 = vld [vmem:[#allocation8 + $0x20] ss:$8 sps:$4 sm:$0xff]   ;;  %v1295_v26 = vld [vmem:[#allocation8 + $0x34] ss:$8 sps:$4 sm:$0xff]   ;;  %v1267_v28 = vld [vmem:[#allocation6 + $0x90] ss:$8 sps:$4 sm:$0xff]  }
  0x77   : > { %593 = vmatpush1.bf16.msra.mxu0 %v1246_v5  ;;  %v1265_v27 = vld [vmem:[#allocation6 + $0x94] ss:$8 sps:$4 sm:$0xff]   ;;  %v1297_v29 = vld [vmem:[#allocation8 + $0x30] ss:$8 sps:$4 sm:$0xff]   ;;  %v1298_v30 = vld [vmem:[#allocation8 + $0x44] ss:$8 sps:$4 sm:$0xff]  }
  0x78   : > { %594 = vmatprep.subr.bf16.mxu0 %v1247_v6  ;;  %v1268_v31 = vld [vmem:[#allocation6 + $0xa4] ss:$8 sps:$4 sm:$0xff]   ;;  %v1270_v32 = vld [vmem:[#allocation6 + $0xa0] ss:$8 sps:$4 sm:$0xff]   ;;  %v1301_v34 = vld [vmem:[#allocation8 + $0x54] ss:$8 sps:$4 sm:$0xff]  }
  0x79   : > { %830 = vmatpush1.bf16.msra.mxu1 %v1291_v21  ;;  %v1300_v33 = vld [vmem:[#allocation8 + $0x40] ss:$8 sps:$4 sm:$0xff]   ;;  %v1271_v35 = vld [vmem:[#allocation6 + $0xb4] ss:$8 sps:$4 sm:$0xff]   ;;  %v1303_v36 = vld [vmem:[#allocation8 + $0x50] ss:$8 sps:$4 sm:$0xff]  }
  0x7a   : > { %831 = vmatprep.subr.bf16.mxu1 %v1292_v22  ;;  %v1273_v37 = vld [vmem:[#allocation6 + $0xb0] ss:$8 sps:$4 sm:$0xff]   ;;  %v1304_v38 = vld [vmem:[#allocation8 + $0x64] ss:$8 sps:$4 sm:$0xff]   ;;  %v1306_v40 = vld [vmem:[#allocation8 + $0x60] ss:$8 sps:$4 sm:$0xff]  }
  0x7b   : > { %595 = vmatpush1.bf16.msra.mxu0 %v1249_v7  ;;  %v1274_v39 = vld [vmem:[#allocation6 + $0xc4] ss:$8 sps:$4 sm:$0xff]   ;;  %v1276_v41 = vld [vmem:[#allocation6 + $0xc0] ss:$8 sps:$4 sm:$0xff]   ;;  %v1307_v42 = vld [vmem:[#allocation8 + $0x74] ss:$8 sps:$4 sm:$0xff]  }
  0x7c   : > { %596 = vmatprep.subr.bf16.mxu0 %v1250_v8  ;;  %v1277_v43 = vld [vmem:[#allocation6 + $0xd4] ss:$8 sps:$4 sm:$0xff]   ;;  %v1309_v44 = vld [vmem:[#allocation8 + $0x70] ss:$8 sps:$4 sm:$0xff]   ;;  %v1310_v46 = vld [vmem:[#allocation8 + $0x84] ss:$8 sps:$4 sm:$0xff]  }
  0x7d   : > { %832 = vmatpush1.bf16.msra.mxu1 %v1294_v25  ;;  %v1279_v45 = vld [vmem:[#allocation6 + $0xd0] ss:$8 sps:$4 sm:$0xff]   ;;  %v1280_v47 = vld [vmem:[#allocation6 + $0xe4] ss:$8 sps:$4 sm:$0xff]   ;;  %v1312_v48 = vld [vmem:[#allocation8 + $0x80] ss:$8 sps:$4 sm:$0xff]  }
  0x7e   : > { %833 = vmatprep.subr.bf16.mxu1 %v1295_v26  ;;  %v1282_v49 = vld [vmem:[#allocation6 + $0xe0] ss:$8 sps:$4 sm:$0xff]   ;;  %v1313_v50 = vld [vmem:[#allocation8 + $0x94] ss:$8 sps:$4 sm:$0xff]   ;;  %v1315_v52 = vld [vmem:[#allocation8 + $0x90] ss:$8 sps:$4 sm:$0xff]  }
  0x7f   : > { %597 = vmatpush1.bf16.msra.mxu0 %v1252_v9  ;;  %v1283_v51 = vld [vmem:[#allocation6 + $0xf4] ss:$8 sps:$4 sm:$0xff]   ;;  %v1285_v53 = vld [vmem:[#allocation6 + $0xf0] ss:$8 sps:$4 sm:$0xff]   ;;  %v1316_v55 = vld [vmem:[#allocation8 + $0xa4] ss:$8 sps:$4 sm:$0xff]  }
  0x80   : > { %598 = vmatprep.subr.bf16.mxu0 %v1253_v10  ;;  %v1318_v57 = vld [vmem:[#allocation8 + $0xa0] ss:$8 sps:$4 sm:$0xff]   ;;  %v1319_v58 = vld [vmem:[#allocation8 + $0xb4] ss:$8 sps:$4 sm:$0xff]   ;;  %v1321_v59 = vld [vmem:[#allocation8 + $0xb0] ss:$8 sps:$4 sm:$0xff]  }
  0x81   : > { %834 = vmatpush1.bf16.msra.mxu1 %v1297_v29  ;;  %v1322_v60 = vld [vmem:[#allocation8 + $0xc4] ss:$8 sps:$4 sm:$0xff]   ;;  %v1324_v61 = vld [vmem:[#allocation8 + $0xc0] ss:$8 sps:$4 sm:$0xff]   ;;  %v1325_v62 = vld [vmem:[#allocation8 + $0xd4] ss:$8 sps:$4 sm:$0xff]  }
  0x82   : > { %835 = vmatprep.subr.bf16.mxu1 %v1298_v30  ;;  %v1327_v63 = vld [vmem:[#allocation8 + $0xd0] ss:$8 sps:$4 sm:$0xff]   ;;  %v1328_v0 = vld [vmem:[#allocation8 + $0xe4] ss:$8 sps:$4 sm:$0xff]   ;;  %v1330_v1 = vld [vmem:[#allocation8 + $0xe0] ss:$8 sps:$4 sm:$0xff]  }
  0x83   : > { %599 = vmatpush1.bf16.msra.mxu0 %v1255_v11  ;;  %v1331_v2 = vld [vmem:[#allocation8 + $0xf4] ss:$8 sps:$4 sm:$0xff]   ;;  %v1333_v3 = vld [vmem:[#allocation8 + $0xf0] ss:$8 sps:$4 sm:$0xff]   ;;  %v419_v5 = vshrl.u32 %v418_v4, 7  ;;  %s954_s18 = sshll.u32 %s366_s22, 4  ;;  %s1779_s18 = int_to_ptr.vmem [resolvable:$true] %s954_s18 }
  0x84   : > { %600 = vmatprep.subr.bf16.mxu0 %v1256_v12  ;;  %v416_v7 = vld [vmem:[%s1828_s2] sm:$0x3]  ;;  %s940_s27 = scalar_lea.sflag [#allocation5], %s1741_s21  ;;  %s1422_s11 = scalar_lea.vmem %s1779_s18, 256 }
  0x85   : > { %836 = vmatpush1.bf16.msra.mxu1 %v1300_v33  ;;  %v420_v6 = vsub.s32 0, %v419_v5  ;;  %v424_v8 = vsub.s32 1, %v419_v5  ;;  %v877_v21 = vld [vmem:[%s1830_s4] sm:$0x3]  ;;  %p1423_p8 = scmp.ne.s32.totalorder %s1779_s18, %s1422_s11  ;;  %p1852_p12 = scmp.ne.s32.totalorder %s1848_s16, 0 }
  0x86   : > { %837 = vmatprep.subr.bf16.mxu1 %v1301_v34  ;;  %s1515_s17 = smov [#allocation9]  }
  0x87   : > { %601 = vmatpush1.bf16.msra.mxu0 %v1258_v13  ;;  %v421_v9 = vrot.slane %v416_v7, %v420_v6  ;;  %v425_v10 = vrot.slane %v416_v7, %v424_v8  ;;  %v882_v22 = vrot.slane %v877_v21, %v420_v6  ;;  %p1424_p1 = pnand %p1423_p8, %p1852_p12  ;;  %s1426_s13 = sshll.u32 %s1515_s17, 4  ;;  %s1427_s13 = int_to_ptr.vmem [resolvable:$false] %s1426_s13 }
  0x88   : > { %602 = vmatprep.subr.bf16.mxu0 %v1259_v18  ;;  %s1428_s14 = scalar_lea.vmem %s1427_s13, 512  ;;  %p1429_p3 = scmp.lt.s32.totalorder %s1779_s18, %s1427_s13 }
  0x89   : > { %838 = vmatpush1.bf16.msra.mxu1 %v1303_v36  ;;  %p1425_p10 = pneg %p1424_p1  ;;  %p1430_p5 = scmp.lt.s32.totalorder %s1428_s14, %s1422_s11 }
  0x8a   : > { %839 = vmatprep.subr.bf16.mxu1 %v1304_v38 }
  0x8b   : > { %603 = vmatpush1.bf16.msra.mxu0 %v1261_v20  ;;  %p1431_p9 = por %p1430_p5, %p1429_p3 }
  0x8c   : > { %604 = vmatprep.subr.bf16.mxu0 %v1262_v23  ;;  %v886_v23 = vrot.slane %v877_v21, %v424_v8 }
  0x8d   : > { %840 = vmatpush1.bf16.msra.mxu1 %v1306_v40  ;;  %p1432_p11 = pnand %p1431_p9, %p1425_p10 }
  0x8e   : > { %841 = vmatprep.subr.bf16.mxu1 %v1307_v42  ;;  %v923_v42 = vld [vmem:[%s1832_s6] sm:$0x3] }
  0x8f   : > { %605 = vmatpush1.bf16.msra.mxu0 %v1264_v24 }
  0x90   : > { %606 = vmatprep.subr.bf16.mxu0 %v1265_v27 }
  0x91   : > { %842 = vmatpush1.bf16.msra.mxu1 %v1309_v44 }
  0x92   : > { %843 = vmatprep.subr.bf16.mxu1 %v1310_v46 }
  0x93   : > { %607 = vmatpush1.bf16.msra.mxu0 %v1267_v28 }
  0x94   : > { %608 = vmatprep.subr.bf16.mxu0 %v1268_v31 }
  0x95   : > { %844 = vmatpush1.bf16.msra.mxu1 %v1312_v48 }
  0x96   : > { %845 = vmatprep.subr.bf16.mxu1 %v1313_v50  ;;  %v928_v50 = vrot.slane %v923_v42, %v420_v6 }
  0x97   : > { %609 = vmatpush1.bf16.msra.mxu0 %v1270_v32 }
  0x98   : > { %610 = vmatprep.subr.bf16.mxu0 %v1271_v35 }
  0x99   : > { %846 = vmatpush1.bf16.msra.mxu1 %v1315_v52 }
  0x9a   : > { %847 = vmatprep.subr.bf16.mxu1 %v1316_v55 }
  0x9b   : > { %611 = vmatpush1.bf16.msra.mxu0 %v1273_v37 }
  0x9c   : > { %612 = vmatprep.subr.bf16.mxu0 %v1274_v39 }
  0x9d   : > { %848 = vmatpush1.bf16.msra.mxu1 %v1318_v57 }
  0x9e   : > { %849 = vmatprep.subr.bf16.mxu1 %v1319_v58 }
  0x9f   : > { %613 = vmatpush1.bf16.msra.mxu0 %v1276_v41  ;;  %v909_v41 = vld [vmem:[%s1831_s5] sm:$0x3] }
  0xa0   : > { %614 = vmatprep.subr.bf16.mxu0 %v1277_v43  ;;  %v918_v46 = vrot.slane %v909_v41, %v424_v8 }
  0xa1   : > { %850 = vmatpush1.bf16.msra.mxu1 %v1321_v59 }
  0xa2   : > { %851 = vmatprep.subr.bf16.mxu1 %v1322_v60 }
  0xa3   : > { %615 = vmatpush1.bf16.msra.mxu0 %v1279_v45  ;;  %v914_v45 = vrot.slane %v909_v41, %v420_v6 }
  0xa4   : > { %616 = vmatprep.subr.bf16.mxu0 %v1280_v47 }
  0xa5   : > { %852 = vmatpush1.bf16.msra.mxu1 %v1324_v61 }
  0xa6   : > { %853 = vmatprep.subr.bf16.mxu1 %v1325_v62 }
  0xa7   : > { %617 = vmatpush1.bf16.msra.mxu0 %v1282_v49 }
  0xa8   : > { %618 = vmatprep.subr.bf16.mxu0 %v1283_v51  ;;  %v932_v51 = vrot.slane %v923_v42, %v424_v8 }
  0xa9   : > { %854 = vmatpush1.bf16.msra.mxu1 %v1327_v63 }
  0xaa   : > { %855 = vmatprep.subr.bf16.mxu1 %v1328_v0 }
  0xab   : > { %619 = vmatpush1.bf16.msra.mxu0 %v1285_v53 }
  0xad   : > { %856 = vmatpush1.bf16.msra.mxu1 %v1330_v1 }
  0xae   : > { %621 = vmatmul.mubr.bf16.vlgmr.msra.gmra.mrb[0].mxu0 %v382_v56  ;;  %857 = vmatprep.subr.bf16.mxu1 %v1331_v2 }
  0xb1   : > { %858 = vmatpush1.bf16.msra.mxu1 %v1333_v3 }
 0x181   : > { %v622_v11 = vpop.f32.mrb[0].mxu0 }
 0x182   : > { %v623_v12 = vadd.f32 %v622_v11, %v421_v9  ;;  %v624_v13 = vpop.f32.mrb[1].mxu0 }
 0x183   : > { %v625_v14 = vadd.f32 %v624_v13, %v425_v10  ;;  %v626_v15 = vpop.f32.mrb[2].mxu0 }
 0x184   : > { %v629_v16 = vmax.f32 %v623_v12, 0.0  ;;  %v627_v17 = vpop.f32.mrb[3].mxu0 }
 0x185   : > { %v630_v18 = vmax.f32 %v625_v14, 0.0 }
 0x186   : > { %v633_v20 = vpack.c.bf16 %v629_v16, %v629_v16 }
 0x187   : > { %v634_v19 = vpack.c.bf16 %v630_v18, %v630_v18 }
 0x189   : > { %859 = vmatprep.mubr.bf16.mxu1 %v634_v19 }
 0x18a   : > { %860 = vmatmul.mubr.bf16.vlgmr.msra.gmra.mrb[0].mxu1 %v633_v20 }
 0x25d   : > { %v861_v24 = vpop.f32.mrb[0].mxu1 }
 0x25e   : > { %v889_v25 = vadd.f32 %v882_v22, %v861_v24  ;;  %v863_v26 = vpop.f32.mrb[1].mxu1 }
 0x25f   : > { %v890_v27 = vadd.f32 %v886_v23, %v863_v26  ;;  %v865_v28 = vpop.f32.mrb[2].mxu1 }
 0x260   : > { %v866_v29 = vpop.f32.mrb[3].mxu1  ;;  %v895_v31 = vmul.f32 %v889_v25, %v889_v25 }
 0x261   : > { %v891_v30 = vadd.f32 %v890_v27, %v889_v25  ;;  %v896_v32 = vmul.f32 %v890_v27, %v890_v27 }
 0x263   : > { %892 = vadd.xlane.f32.xlu0 %v891_v30  ;;  %v897_v33 = vadd.f32 %v896_v32, %v895_v31 }
 0x267   : > { %898 = vadd.xlane.f32.xlu0 %v897_v33 }
 0x2f0   : > { %v893_v34 = vpop.xlane.xlu0 %892 }
 0x2f1   : > { %v894_v35 = vmul.f32 0.00390625, %v893_v34 }
 0x2f3   : > { %v901_v37 = vmul.f32 %v894_v35, %v894_v35  ;;  %v903_v43 = vsub.f32 %v889_v25, %v894_v35  ;;  %v904_v44 = vsub.f32 %v890_v27, %v894_v35 }
 0x2f4   : > { %v899_v36 = vpop.xlane.xlu0 %898 }
 0x2f5   : > { %v900_v38 = vmul.f32 0.00390625, %v899_v36 }
 0x2f7   : > { %v902_v39 = vsub.f32 %v900_v38, %v901_v37 }
 0x2f9   : > { %v905_v40 = vadd.f32 1e-05, %v902_v39 }
 0x2fb   : > { %1334 = vrsqrt.f32 %v905_v40 }
 0x305   : > { %v1335_v47 = vpop.eup %1334 }
 0x306   : > { %v907_v48 = vmul.f32 %v1335_v47, %v903_v43  ;;  %v908_v49 = vmul.f32 %v1335_v47, %v904_v44 }
 0x308   : > { %v921_v52 = vmul.f32 %v914_v45, %v907_v48  ;;  %v922_v53 = vmul.f32 %v918_v46, %v908_v49 }
 0x30a   : > { %v935_v54 = vadd.f32 %v928_v50, %v921_v52  ;;  %v936_v55 = vadd.f32 %v932_v51, %v922_v53 }
 0x30c   : > { %937 = vst [vmem:[%s366_s22] sm:$0xff] %v935_v54  ;;  %938 = vst [vmem:[%s366_s22 + $0x8] sm:$0xff] %v936_v55 }
 0x30d   : > { %1435 = shalt.err (!%p1432_p11)
}
 0x30e   : > { %s1436_s21 = scalar_lea.hbm %s1777_s9, 256  ;;  %s1440_s12 = scalar_lea.hbm %s1833_s7, 512 }
 0x30f   : > { %p1437_p0 = scmp.ne.s32.totalorder %s1777_s9, %s1436_s21  ;;  %p1441_p6 = scmp.lt.u32.totalorder %s1777_s9, %s1833_s7 }
 0x310   : > { %p1442_p7 = scmp.lt.u32.totalorder %s1440_s12, %s1436_s21  ;;  %p1444_p8 = scmp.lt.u32.totalorder %s1436_s21, %s1777_s9 }
 0x311   : > { %p1438_p4 = pnand %p1437_p0, %p1852_p12 }
 0x312   : > { %p1443_p2 = por %p1442_p7, %p1441_p6 }
 0x313   : > { %p1439_p13 = pneg %p1438_p4 }
 0x314   : > { %p1445_p1 = por %p1444_p8, %p1443_p2 }
 0x316   : > { %p1446_p10 = pnand %p1445_p1, %p1439_p13 }
 0x318   : > { %1449 = shalt.err (!%p1446_p10)
}
 0x319   : > { %1163 = dma.vmem_to_hbm [thread:$0]  (%p1852_p12), %s1779_s18, 256, %s1777_s9, %s940_s27  }
 0x31a PF: > { %s1853_s22 = sld [smem:[#allocation13_spill]]  ;;  %s1854_s30 = sld [smem:[#allocation14_spill]] }
 0x31b   : > { %p1856_p5 = scmp.ge.s32.totalorder %s1508_s29, 2 }
 0x320   : > { %s966_s8 = sand.u32 1, %s1853_s22   ;;  %p1855_p3 = scmp.ne.s32.totalorder %s1854_s30, 0 }
 0x321   : > { %s967_s11 = scalar_lea.sflag [#allocation5], %s966_s8 }
 0x322   : > { %p1177_p9 = pnand %p1856_p5, %p1855_p3 }
 0x324   : > { %1483 = dma.done.wait (!%p1177_p9), %s967_s11, 256  }
 0x325   : > { %1485 = vsyncadd (!%p1177_p9), %s967_s11, 4294967040  ;;  %s24_s29 = sadd.s32 1, %s1508_s29   ;;  %s1857_s24 = smov %s1492_s25 }
 0x326   : > { %p21_p11 = scmp.ge.s32.totalorder %s24_s29, 4   ;;  %s1858_s25 = smov %s1496_s26 }
 0x327   : > { %s1859_s26 = smov %s1698_s19  ;;  %s1860_s27 = smov %s1504_s28 }
 0x328   : > { %s1861_s28 = smov %s1863_s20  ;;  %23 = sbr.rel (!%p21_p11) target bundleno = 7 (0x7), region = 114 }
 0x32f   :  { %972 = vsyncpa [#allocation4], 1 }
 0x330   :  { %974 = vsyncpa [#allocation4 + $0x1], 1 }
 0x331   :  { %975 = vsyncpa [#allocation7], 1 }
 0x332   :  { %976 = vsyncpa [#allocation5], 1 }
 0x333   :  { %978 = vsyncpa [#allocation5 + $0x1], 1 }

</bundles_post_ra>
